<compile_context>
chip_gen: v5e
topology: v5e:2x2
jax: 0.10.0
libtpu: 0.0.40
codegen_flags: <defaults>
</compile_context>

<pallas_src>
import jax
import jax.numpy as jnp
from jax.experimental import pallas as pl
from jax.experimental.pallas import tpu as pltpu

LANE = 128        # padded feature width of every layer (lane-dense weights)
SUBLANE = 8       # f32 sublane count
BATCH_ALIGN = 16  # bf16 sublane pack factor -> row-tile / obs_pad alignment


def _round_up(x: int, m: int) -> int:
    return (x + m - 1) // m * m


# ----------------------------- kernel ---------------------------------------


def make_mlp_kernel(num_layers: int, obs_pad: int, act_dim: int, w_dtype):
    """Fused MLP: (x_tile[bf16], W_slab, b_slab) -> logits_tile[f32, act_dim wide]."""

    def kernel(x_ref, w_ref, b_ref, o_ref):
        # x already arrives in the MXU dtype (bf16): no f32->bf16 round trip.
        # Layer 0 uses only the first obs_pad weight rows; obs_pad is 16-aligned so
        # this slice is a zero-cost view of the packed bf16 tile.
        h = jnp.dot(x_ref[...], w_ref[0, :obs_pad, :],
                    preferred_element_type=jnp.float32)        # MXU, f32 accumulate
        h = h + b_ref[0]                                       # (1, 128) f32 broadcast
        for i in range(1, num_layers):                         # statically unrolled
            h = jnp.tanh(h)                                    # hidden Tanh (f32 EUP)
            h = jnp.dot(h.astype(w_dtype), w_ref[i],
                        preferred_element_type=jnp.float32)
            h = h + b_ref[i]
        # Final layer activation is Identity.  Store only the live logit lanes:
        # output HBM traffic is act_dim wide instead of 128 (16x less for act_dim=8).
        o_ref[...] = h[:, :act_dim]

    return kernel


# ----------------------------- params ----------------------------------------


def init_mlp_params(key, sizes):
    """nn.Linear-style init; W stored as [in, out], b as [1, out]."""
    params = []
    for j in range(len(sizes) - 1):
        fan_in, fan_out = sizes[j], sizes[j + 1]
        key, kw, kb = jax.random.split(key, 3)
        bound = 1.0 / jnp.sqrt(jnp.float32(fan_in))
        w = jax.random.uniform(kw, (fan_in, fan_out), jnp.float32, -bound, bound)
        b = jax.random.uniform(kb, (1, fan_out), jnp.float32, -bound, bound)
        params.append((w, b))
    return params


def pack_params(params, w_dtype=jnp.bfloat16):
    """Pack per-layer (W, b) into one weight slab and one bias slab (zero-padded)."""
    num_layers = len(params)
    w_slab = jnp.zeros((num_layers, LANE, LANE), w_dtype)
    b_slab = jnp.zeros((num_layers, 1, LANE), jnp.float32)
    for i, (w, b) in enumerate(params):
        fan_in, fan_out = w.shape
        assert fan_in <= LANE and fan_out <= LANE, "layer width must be <= 128"
        w_slab = w_slab.at[i, :fan_in, :fan_out].set(w.astype(w_dtype))
        b_slab = b_slab.at[i, 0, :fan_out].set(b.reshape(-1).astype(jnp.float32))
    return w_slab, b_slab


# ----------------------------- wrapper ----------------------------------------


def mlp_categorical_forward(x, w_slab, b_slab, obs_dim, act_dim, tile_b_max=2048):
    """Pallas-fused MLPCategorical.forward -> logits [batch, act_dim] (f32)."""
    batch = x.shape[0]
    num_layers = w_slab.shape[0]
    w_dtype = w_slab.dtype

    # bf16 packs 16 rows per (16,128) tile: align obs_pad to 16 so the in-kernel
    # layer-0 weight slice never crosses a packed tile boundary.
    obs_align = BATCH_ALIGN if w_dtype == jnp.bfloat16 else SUBLANE
    obs_pad = _round_up(obs_dim, obs_align)

    # Row tiling: big tiles to amortize per-grid-step overhead; >= 2 steps when there
    # is enough work so v7x's two TensorCores both get a share; pb rounded only to
    # tile_b * n_steps so awkward batch sizes don't pay ~2x padded FLOPs/writeback.
    pb0 = _round_up(max(batch, 1), SUBLANE)
    n_steps = int(pl.cdiv(pb0, tile_b_max))
    if pb0 >= 2 * BATCH_ALIGN:
        n_steps = max(n_steps, 2)
    tile_b = _round_up(int(pl.cdiv(pb0, n_steps)), BATCH_ALIGN)
    pb = tile_b * n_steps
    # Per-step VMEM at tile 2048: double-buffered x (64 KiB bf16) + out (64 KiB f32)
    # + resident 96 KiB weight slab + a few MiB of f32 intermediates -- well inside
    # the scoped-VMEM defaults on v5e/v6e/v7x, so no vmem_limit_bytes override.

    # Zero-pad batch/features and cast x to the MXU dtype here (halves the x DMA and
    # removes a per-step full-tile convert).  Zero padding stays exactly zero through
    # every layer, so the final slices are exact.
    x_p = jnp.zeros((pb, obs_pad), w_dtype).at[:batch, :obs_dim].set(
        x.astype(w_dtype))

    kernel = make_mlp_kernel(num_layers, obs_pad, act_dim, w_dtype)

    itemsize = jnp.dtype(w_dtype).itemsize
    cost = pl.CostEstimate(
        flops=2 * pb * (obs_pad * LANE + max(num_layers - 1, 0) * LANE * LANE),
        transcendentals=pb * LANE * max(num_layers - 1, 0),
        bytes_accessed=int(x_p.size * itemsize
                           + w_slab.size * itemsize
                           + b_slab.size * 4
                           + pb * act_dim * 4),
    )

    out = pl.pallas_call(
        kernel,
        out_shape=jax.ShapeDtypeStruct((pb, act_dim), jnp.float32),
        grid=(n_steps,),
        in_specs=[
            pl.BlockSpec((tile_b, obs_pad), lambda i: (i, 0)),            # x: batch-tiled
            # Parameter slabs: constant index_map -> fetched once, VMEM-resident.
            pl.BlockSpec((num_layers, LANE, LANE), lambda i: (0, 0, 0)),
            pl.BlockSpec((num_layers, 1, LANE), lambda i: (0, 0, 0)),
        ],
        out_specs=pl.BlockSpec((tile_b, act_dim), lambda i: (i, 0)),
        compiler_params=pltpu.CompilerParams(
            dimension_semantics=("parallel",)),   # v7x: shard batch across both TCs
        cost_estimate=cost,
    )(x_p, w_slab, b_slab)

    return out[:batch]


# ----------------------------- reference --------------------------------------


def mlp_reference(x, params, w_dtype=jnp.bfloat16):
    """Pure-JAX reference mirroring the kernel numerics (bf16 matmul, f32 accum)."""
    h = x.astype(jnp.float32)
    for i, (w, b) in enumerate(params):
        h = jnp.dot(h.astype(w_dtype), w.astype(w_dtype),
                    preferred_element_type=jnp.float32) + b.astype(jnp.float32)
        if i < len(params) - 1:
            h = jnp.tanh(h)
    return h


# ----------------------------- main --------------------------------------------


if __name__ == "__main__":
    # Small shapes consistent with the module: obs_dim=16, hidden=[32, 32], act_dim=8
    obs_dim, hidden_sizes, act_dim = 16, [32, 32], 8

    key = jax.random.PRNGKey(0)
    key, kx1, kx2 = jax.random.split(key, 3)

    params = init_mlp_params(key, [obs_dim] + hidden_sizes + [act_dim])
    w_slab, b_slab = pack_params(params)

    # batch=8: single-step grid; batch=50: multi-step grid + ragged tail padding.
    for batch, kx in ((8, kx1), (50, kx2)):
        x = jax.random.normal(kx, (batch, obs_dim), jnp.float32)
        logits = mlp_categorical_forward(x, w_slab, b_slab, obs_dim, act_dim)
        logits = jax.block_until_ready(logits)

        ref = mlp_reference(x, params)
        assert logits.shape == (batch, act_dim)
        assert jnp.allclose(logits, ref, atol=1e-3, rtol=1e-3), \
            f"mismatch vs reference (batch={batch})"

    print("KERNEL_OK")
</pallas_src>

<mosaic_0001>
module attributes {stable_mosaic.version = 11 : i64} {
  func.func @kernel(%arg0: i32, %arg1: memref<16x16xbf16, #tpu.memory_space<vmem>>, %arg2: memref<3x128x128xbf16, #tpu.memory_space<vmem>>, %arg3: memref<3x1x128xf32, #tpu.memory_space<vmem>>, %arg4: memref<16x8xf32, #tpu.memory_space<vmem>>) attributes {dimension_semantics = [#tpu.dimension_semantics<parallel>], iteration_bounds = array<i64: 1>, scalar_prefetch = 0 : i64, scratch_operands = 0 : i64, tpu.core_type = #tpu.core_type<tc>, window_params = [{transform_indices = @transform_0, window_bounds = array<i64: 16, 16>}, {pipeline_mode = #tpu.pipeline_mode<synchronous>, transform_indices = @transform_1, window_bounds = array<i64: 3, 128, 128>}, {pipeline_mode = #tpu.pipeline_mode<synchronous>, transform_indices = @transform_2, window_bounds = array<i64: 3, 1, 128>}, {transform_indices = @transform_3, window_bounds = array<i64: 16, 8>}]} {
    %c0 = arith.constant 0 : index
    %c0_0 = arith.constant 0 : index
    %0 = vector.load %arg1[%c0, %c0_0] : memref<16x16xbf16, #tpu.memory_space<vmem>>, vector<16x16xbf16>
    %c0_1 = arith.constant 0 : index
    %c0_2 = arith.constant 0 : index
    %c0_3 = arith.constant 0 : index
    %1 = vector.load %arg2[%c0_1, %c0_2, %c0_3] : memref<3x128x128xbf16, #tpu.memory_space<vmem>>, vector<1x16x128xbf16>
    %2 = vector.shape_cast %1 : vector<1x16x128xbf16> to vector<16x128xbf16>
    %cst = arith.constant dense<0.000000e+00> : vector<16x128xf32>
    %3 = tpu.matmul %0, %2, %cst {dimension_numbers = #tpu.dot_dimension_numbers<[1], [0], [0], [1], [0, 0, 1, 1], [], []>} : vector<16x16xbf16>, vector<16x128xbf16>, vector<16x128xf32> -> vector<16x128xf32>
    %c0_4 = arith.constant 0 : index
    %c0_5 = arith.constant 0 : index
    %c0_6 = arith.constant 0 : index
    %4 = vector.load %arg3[%c0_4, %c0_5, %c0_6] : memref<3x1x128xf32, #tpu.memory_space<vmem>>, vector<1x1x128xf32>
    %5 = vector.shape_cast %4 : vector<1x1x128xf32> to vector<1x128xf32>
    %6 = vector.broadcast %5 : vector<1x128xf32> to vector<16x128xf32>
    %7 = arith.addf %3, %6 : vector<16x128xf32>
    %8 = math.tanh %7 : vector<16x128xf32>
    %9 = arith.truncf %8 : vector<16x128xf32> to vector<16x128xbf16>
    %c1 = arith.constant 1 : index
    %c0_7 = arith.constant 0 : index
    %c0_8 = arith.constant 0 : index
    %10 = vector.load %arg2[%c1, %c0_7, %c0_8] : memref<3x128x128xbf16, #tpu.memory_space<vmem>>, vector<1x128x128xbf16>
    %11 = vector.shape_cast %10 : vector<1x128x128xbf16> to vector<128x128xbf16>
    %cst_9 = arith.constant dense<0.000000e+00> : vector<16x128xf32>
    %12 = tpu.matmul %9, %11, %cst_9 {dimension_numbers = #tpu.dot_dimension_numbers<[1], [0], [0], [1], [0, 0, 1, 1], [], []>} : vector<16x128xbf16>, vector<128x128xbf16>, vector<16x128xf32> -> vector<16x128xf32>
    %c1_10 = arith.constant 1 : index
    %c0_11 = arith.constant 0 : index
    %c0_12 = arith.constant 0 : index
    %13 = vector.load %arg3[%c1_10, %c0_11, %c0_12] : memref<3x1x128xf32, #tpu.memory_space<vmem>>, vector<1x1x128xf32>
    %14 = vector.shape_cast %13 : vector<1x1x128xf32> to vector<1x128xf32>
    %15 = vector.broadcast %14 : vector<1x128xf32> to vector<16x128xf32>
    %16 = arith.addf %12, %15 : vector<16x128xf32>
    %17 = math.tanh %16 : vector<16x128xf32>
    %18 = arith.truncf %17 : vector<16x128xf32> to vector<16x128xbf16>
    %c2 = arith.constant 2 : index
    %c0_13 = arith.constant 0 : index
    %c0_14 = arith.constant 0 : index
    %19 = vector.load %arg2[%c2, %c0_13, %c0_14] : memref<3x128x128xbf16, #tpu.memory_space<vmem>>, vector<1x128x128xbf16>
    %20 = vector.shape_cast %19 : vector<1x128x128xbf16> to vector<128x128xbf16>
    %cst_15 = arith.constant dense<0.000000e+00> : vector<16x128xf32>
    %21 = tpu.matmul %18, %20, %cst_15 {dimension_numbers = #tpu.dot_dimension_numbers<[1], [0], [0], [1], [0, 0, 1, 1], [], []>} : vector<16x128xbf16>, vector<128x128xbf16>, vector<16x128xf32> -> vector<16x128xf32>
    %c2_16 = arith.constant 2 : index
    %c0_17 = arith.constant 0 : index
    %c0_18 = arith.constant 0 : index
    %22 = vector.load %arg3[%c2_16, %c0_17, %c0_18] : memref<3x1x128xf32, #tpu.memory_space<vmem>>, vector<1x1x128xf32>
    %23 = vector.shape_cast %22 : vector<1x1x128xf32> to vector<1x128xf32>
    %24 = vector.broadcast %23 : vector<1x128xf32> to vector<16x128xf32>
    %25 = arith.addf %21, %24 : vector<16x128xf32>
    %26 = vector.extract_strided_slice %25 {offsets = [0, 0], sizes = [16, 8], strides = [1, 1]} : vector<16x128xf32> to vector<16x8xf32>
    %c0_19 = arith.constant 0 : index
    %c0_20 = arith.constant 0 : index
    %27 = vector.load %arg4[%c0_19, %c0_20] : memref<16x8xf32, #tpu.memory_space<vmem>>, vector<16x8xf32>
    tpu.vector_store %arg4[%c0_19, %c0_20], %26 {strides = array<i32>} : memref<16x8xf32, #tpu.memory_space<vmem>>, vector<16x8xf32>,
    return
  }
  func.func @transform_0(%arg0: i32) -> (i32, i32) {
    %c0_i32 = arith.constant 0 : i32
    %c0_i32_0 = arith.constant 0 : i32
    return %arg0, %c0_i32 : i32, i32
  }
  func.func @transform_1(%arg0: i32) -> (i32, i32, i32) {
    %c0_i32 = arith.constant 0 : i32
    %c0_i32_0 = arith.constant 0 : i32
    %c0_i32_1 = arith.constant 0 : i32
    %c0_i32_2 = arith.constant 0 : i32
    return %c0_i32, %c0_i32_0, %c0_i32_1 : i32, i32, i32
  }
  func.func @transform_2(%arg0: i32) -> (i32, i32, i32) {
    %c0_i32 = arith.constant 0 : i32
    %c0_i32_0 = arith.constant 0 : i32
    %c0_i32_1 = arith.constant 0 : i32
    %c0_i32_2 = arith.constant 0 : i32
    return %c0_i32, %c0_i32_0, %c0_i32_1 : i32, i32, i32
  }
  func.func @transform_3(%arg0: i32) -> (i32, i32) {
    %c0_i32 = arith.constant 0 : i32
    %c0_i32_0 = arith.constant 0 : i32
    return %arg0, %c0_i32 : i32, i32
  }
}

</mosaic_0001>

<bundles_post_ra>
// kernel: tpu_custom_call.1
= control target key start
LH: loop header
LB: loop body
LE: loop exit
PB: predicated region body
PF: predicated region fallthrough
CT: control target
= control target key end

     0   :  { %8 = vsyncpa [#allocation3], 0  ;;  %s509_s0 = inlined_call_operand.hbm [shape: bf16[16,16], index: 0, kind: input, shape index: {}]   ;;  %s510_s1 = inlined_call_operand.hbm [shape: bf16[3,128,128], index: 1, kind: input, shape index: {}]   ;;  %s511_s2 = inlined_call_operand.hbm [shape: f32[3,1,128], index: 2, kind: input, shape index: {}]   ;;  %s512_s3 = inlined_call_operand.vmem [shape: f32[16,8], index: 3, kind: output, shape index: {}]  }
   0x1   :  { %9 = vsyncpa [#allocation5], 0  ;;  %s27_s14 = sshll.u32 %s510_s1, 4  ;;  %s467_s15 = smov [#allocation4]   ;;  %s28_s14 = int_to_ptr.hbm [resolvable:$true] %s27_s14 }
   0x2   :  { %s29_s16 = sshll.u32 %s467_s15, 4  ;;  %s14_s19 = sshll.u32 %s509_s0, 4  ;;  %s30_s16 = int_to_ptr.vmem [resolvable:$true] %s29_s16  ;;  %s15_s19 = int_to_ptr.hbm [resolvable:$true] %s14_s19 }
   0x3   :  { %s468_s20 = smov 64   ;;  %s469_s21 = smov 4  }
   0x4   :  { %35 = dma.hbm_to_vmem [thread:$0]  %s28_s14, 3072, %s30_s16, [#allocation5], %s468_s20, %s468_s20, %s469_s21  }
   0x5   :  { %s470_s22 = smov [#allocation2]   ;;  %s40_s26 = sshll.u32 %s511_s2, 4  ;;  %s41_s26 = int_to_ptr.hbm [resolvable:$true] %s40_s26 }
   0x6   :  { %s16_s23 = sshll.u32 %s470_s22, 4  ;;  %s471_s1 = smov [#allocation6]   ;;  %s17_s23 = int_to_ptr.vmem [resolvable:$true] %s16_s23 }
   0x7   :  { %22 = dma.hbm_to_vmem [thread:$0]  %s15_s19, 128, %s17_s23, [#allocation3], %s468_s20, %s468_s20, %s469_s21  }
   0x8   :  { %s42_s27 = sshll.u32 %s471_s1, 4  ;;  %s472_s28 = smov 16   ;;  %s43_s27 = int_to_ptr.vmem [resolvable:$true] %s42_s27 }
   0x9   :  { %s473_s29 = smov 1  }
   0xa   :  { %48 = dma.hbm_to_vmem [thread:$0]  %s41_s26, 48, %s43_s27, [#allocation5], %s472_s28, %s472_s28, %s473_s29  }
   0xb   :  { %463 = dma.done.wait [#allocation3], 128  }
   0xc   :  { %464 = vsyncadd [#allocation3], 4294967168 }
   0xd   :  { %465 = dma.done.wait [#allocation5], 3120  }
   0xe   :  { %466 = vsyncadd [#allocation5], 4294964176  ;;  %v356_v0 = vld [vmem:[#allocation4] sm:$0xff]  ;;  %v364_v1 = vld [vmem:[#allocation4 + $0x78] sm:$0xff]  ;;  %vm81_vm0 = vcmask 130048   ;;  %vm273_vm1 = vcmask 64512  }
   0xf   :  { %v355_v2 = vld [vmem:[#allocation2] sm:$0xff]  ;;  %92 = vmatpush.bf16.msra.mxu0 %v356_v0  ;;  %172 = vmatpush.bf16.msra.mxu1 %v364_v1  ;;  %v363_v3 = vld [vmem:[#allocation4 + $0x70] sm:$0xff]  ;;  %v362_v4 = vld [vmem:[#allocation4 + $0x68] sm:$0xff] }
  0x10   :  { %v361_v5 = vld [vmem:[#allocation4 + $0x60] sm:$0xff]  ;;  %v360_v6 = vld [vmem:[#allocation4 + $0x58] sm:$0xff]  ;;  %v359_v7 = vld [vmem:[#allocation4 + $0x50] sm:$0xff] }
  0x11   :  { %v358_v8 = vld [vmem:[#allocation4 + $0x48] sm:$0xff]  ;;  %v357_v9 = vld [vmem:[#allocation4 + $0x40] sm:$0xff]  ;;  %v372_v10 = vld [vmem:[#allocation4 + $0xb8] sm:$0xff] }
  0x12   :  { %290 = vmatmul.msk.bf16.vlgmr.msra.gmra.mxu0 %vm81_vm0, %v355_v2  ;;  %259 = vmatpush.bf16.msra.mxu2 %v372_v10  ;;  %v371_v11 = vld [vmem:[#allocation4 + $0xb0] sm:$0xff]  ;;  %v370_v12 = vld [vmem:[#allocation4 + $0xa8] sm:$0xff]  ;;  %v380_v14 = vld [vmem:[#allocation6] ss:$0 sm:$0xff] }
  0x13   :  { %173 = vmatpush.bf16.msra.mxu1 %v363_v3  ;;  %v369_v21 = vld [vmem:[#allocation4 + $0xa0] sm:$0xff]  ;;  %v368_v22 = vld [vmem:[#allocation4 + $0x98] sm:$0xff]  ;;  %v367_v23 = vld [vmem:[#allocation4 + $0x90] sm:$0xff] }
  0x14   :  { %v366_v24 = vld [vmem:[#allocation4 + $0x88] sm:$0xff]  ;;  %v365_v25 = vld [vmem:[#allocation4 + $0x80] sm:$0xff] }
  0x15   :  { %v381_v27 = vld [vmem:[#allocation6 + $0x1] ss:$0 sm:$0xff]  ;;  %v382_v34 = vld [vmem:[#allocation6 + $0x2] ss:$0 sm:$0xff] }
  0x16   :  { %260 = vmatpush.bf16.msra.mxu2 %v371_v11 }
  0x17   :  { %174 = vmatpush.bf16.msra.mxu1 %v362_v4 }
  0x1a   :  { %261 = vmatpush.bf16.msra.mxu2 %v370_v12 }
  0x1b   :  { %175 = vmatpush.bf16.msra.mxu1 %v361_v5 }
  0x1e   :  { %262 = vmatpush.bf16.msra.mxu2 %v369_v21 }
  0x1f   :  { %176 = vmatpush.bf16.msra.mxu1 %v360_v6 }
  0x22   :  { %263 = vmatpush.bf16.msra.mxu2 %v368_v22 }
  0x23   :  { %177 = vmatpush.bf16.msra.mxu1 %v359_v7 }
  0x26   :  { %264 = vmatpush.bf16.msra.mxu2 %v367_v23 }
  0x27   :  { %178 = vmatpush.bf16.msra.mxu1 %v358_v8 }
  0x2a   :  { %265 = vmatpush.bf16.msra.mxu2 %v366_v24 }
  0x2b   :  { %179 = vmatpush.bf16.msra.mxu1 %v357_v9 }
  0x2e   :  { %266 = vmatpush.bf16.msra.mxu2 %v365_v25 }
  0x8f   :  { %v94_v13 = vpop.f32.mrf.mxu0 }
  0x90   :  { %v95_v15 = vadd.f32 %v380_v14, %v94_v13 }
  0x92   :  { %383 = vtanh.f32 %v95_v15 }
  0x97   :  { %v96_v16 = vpop.f32.mrf.mxu0 }
  0x98   :  { %v97_v17 = vadd.f32 %v380_v14, %v96_v16  ;;  %v384_v18 = vpop.eup %383 }
  0x9a   :  { %385 = vtanh.f32 %v97_v17 }
  0xa0   :  { %v386_v19 = vpop.eup %385 }
  0xa1   :  { %v101_v20 = vpack.c.bf16 %v386_v19, %v384_v18 }
  0xa3   :  { %180 = vmatmul.bf16.vlgmr.msra.gmra.mxu1 %v101_v20 }
 0x120   :  { %v181_v26 = vpop.f32.mrf.mxu1 }
 0x121   :  { %v182_v28 = vadd.f32 %v381_v27, %v181_v26 }
 0x123   :  { %387 = vtanh.f32 %v182_v28 }
 0x128   :  { %v183_v29 = vpop.f32.mrf.mxu1 }
 0x129   :  { %v184_v30 = vadd.f32 %v381_v27, %v183_v29  ;;  %v388_v31 = vpop.eup %387 }
 0x12b   :  { %389 = vtanh.f32 %v184_v30 }
 0x131   :  { %v390_v32 = vpop.eup %389 }
 0x132   :  { %v188_v33 = vpack.c.bf16 %v390_v32, %v388_v31 }
 0x134   :  { %267 = vmatmul.bf16.vlgmr.msra.gmra.mxu2 %v188_v33 }
 0x1b7   :  { %v268_v35 = vpop.f32.mrf.mxu2 }
 0x1b8   :  { %v269_v36 = vadd.f32 %v382_v34, %v268_v35 }
 0x1ba   :  { %274 = vst.msk [vmem:[%s512_s3] sm:$0xff] %vm273_vm1, %v269_v36 }
 0x1bf   :  { %v270_v37 = vpop.f32.mrf.mxu2 }
 0x1c0   :  { %v271_v38 = vadd.f32 %v382_v34, %v270_v37 }
 0x1c2   :  { %275 = vst.msk [vmem:[%s512_s3 + $0x8] sm:$0xff] %vm273_vm1, %v271_v38 }
 0x1c3   :  { %280 = vsyncpa [#allocation3], 1 }
 0x1c4   :  { %281 = vsyncpa [#allocation5], 1 }

</bundles_post_ra>
